<compile_context>
chip_gen: v5e
topology: v5e:2x2
jax: 0.10.0
libtpu: 0.0.40
codegen_flags: <defaults>
</compile_context>

<pallas_src>
import functools

import jax
import jax.numpy as jnp
from jax.experimental import pallas as pl
from jax.experimental.pallas import tpu as pltpu


AP = 128  # lane-dense padded action width (one full vreg lane extent)


def _round_up(x, m):
    return (x + m - 1) // m * m


def dgn_kernel(x_ref, w1_ref, b1_ref, w2_ref, b2_ref, w3_ref, b3_ref,
               pi_ref, logp_ref, act_ref, stats_ref, *, n_actions):
    x = x_ref[...]

    # --- MLP (MXU) ---
    h1 = jnp.maximum(
        jnp.dot(x, w1_ref[...], preferred_element_type=jnp.float32)
        + b1_ref[...], 0.0)
    h2 = jnp.maximum(
        jnp.dot(h1, w2_ref[...], preferred_element_type=jnp.float32)
        + b2_ref[...], 0.0)
    # Last layer is padded to AP lanes: padded cols have zero weights and a
    # -1e30 bias, so they never win the row max and vanish under exp().
    out = (jnp.dot(h2, w3_ref[...], preferred_element_type=jnp.float32)
           + b3_ref[...])

    lane = jax.lax.broadcasted_iota(jnp.int32, out.shape, dimension=1)
    valid = lane < n_actions

    # --- softmax / log_softmax over the action axis ---
    m = jnp.max(out, axis=1, keepdims=True)           # padded lanes are -1e30
    z = out - m
    e = jnp.exp(z)                                    # exactly 0 on padded lanes
    s = jnp.sum(e, axis=1, keepdims=True)
    inv_s = pl.reciprocal(s, approx=False)            # EUP slot, exact
    prob = e * inv_s
    log_s = jnp.log(s)                                # shared by logp and entropy
    logp = z - log_s

    # --- lane-dense outputs (full-vreg stores) ---
    pi_ref[...] = out
    logp_ref[...] = logp
    # onehot_from_logits (deterministic): argmax one-hot from raw logits
    # (monotone under softmax).
    act_ref[...] = (out >= m).astype(act_ref.dtype)

    # --- per-row partial statistics, packed into lanes 0 / 1 ---
    out_v = jnp.where(valid, out, 0.0)
    row_reg = jnp.sum(out_v * out_v, axis=1, keepdims=True)              # (tb, 1)
    row_ent = -jnp.sum(jnp.where(valid, logp * prob, 0.0),
                       axis=1, keepdims=True)                            # (tb, 1)
    stats_ref[...] = (jnp.where(lane == 0, row_reg, 0.0)
                      + jnp.where(lane == 1, row_ent, 0.0))


def discrete_gaussian_net(state, params, *, tb=256):
    """Full forward pass (sample=False) in one grid-tiled Pallas call.

    Returns (action, log_prob, pi, entropy, reg_pi); specific_log_prob is None
    in the sample=False path of the original module.
    """
    B, D = state.shape
    H = params["w1"].shape[1]
    A = params["w3"].shape[1]
    assert A <= AP, "n_actions must fit in one 128-lane vreg"

    # Batch tiling: tile size is a multiple of 8 sublanes; batch is padded up
    # to a tile multiple so any B works (stack many env steps per call to
    # amortize the fixed pallas_call/DMA overhead).
    tb = min(_round_up(tb, 8), _round_up(B, 8))
    Bp = _round_up(B, tb)
    if Bp != B:
        state = jnp.pad(state, ((0, Bp - B), (0, 0)))
    grid = (Bp // tb,)

    # Pad the last layer to a lane-dense output width.
    w3p = jnp.pad(params["w3"], ((0, 0), (0, AP - A)))
    b3p = jnp.pad(params["b3"], ((0, 0), (0, AP - A)), constant_values=-1e30)

    batch_spec_in = pl.BlockSpec((tb, D), lambda i: (i, 0))
    resident = lambda shape: pl.BlockSpec(shape, lambda i: (0, 0))  # stays in VMEM
    out_spec = pl.BlockSpec((tb, AP), lambda i: (i, 0))

    out_shapes = (
        jax.ShapeDtypeStruct((Bp, AP), jnp.float32),  # pi (raw logits, padded)
        jax.ShapeDtypeStruct((Bp, AP), jnp.float32),  # log_prob (padded)
        jax.ShapeDtypeStruct((Bp, AP), jnp.float32),  # action one-hot (padded)
        jax.ShapeDtypeStruct((Bp, AP), jnp.float32),  # stats: lane0=reg, lane1=ent
    )

    pi_p, logp_p, act_p, stats = pl.pallas_call(
        functools.partial(dgn_kernel, n_actions=A),
        out_shape=out_shapes,
        grid=grid,
        in_specs=[
            batch_spec_in,
            resident((D, H)), resident((1, H)),
            resident((H, H)), resident((1, H)),
            resident((H, AP)), resident((1, AP)),
        ],
        out_specs=(out_spec, out_spec, out_spec, out_spec),
        compiler_params=pltpu.CompilerParams(
            dimension_semantics=("parallel",)),
    )(state,
      params["w1"], params["b1"],
      params["w2"], params["b2"],
      w3p, b3p)

    pi = pi_p[:B, :A]
    log_prob = logp_p[:B, :A]
    action = act_p[:B, :A]
    reg_pi = jnp.sum(stats[:B, 0]) / jnp.float32(B * A)   # mean(out**2)
    entropy = jnp.mean(stats[:B, 1])                      # -(logp*p).sum(1).mean()
    return action, log_prob, pi, entropy, reg_pi


def init_params(key, input_dim, hidden, n_actions):
    """Deterministic synthetic parameter init (weights stored as (in, out))."""
    k1, k2, k3, k4, k5, k6 = jax.random.split(key, 6)
    scale = 0.1
    return {
        "w1": scale * jax.random.normal(k1, (input_dim, hidden), jnp.float32),
        "b1": scale * jax.random.normal(k2, (1, hidden), jnp.float32),
        "w2": scale * jax.random.normal(k3, (hidden, hidden), jnp.float32),
        "b2": scale * jax.random.normal(k4, (1, hidden), jnp.float32),
        "w3": scale * jax.random.normal(k5, (hidden, n_actions), jnp.float32),
        "b3": scale * jax.random.normal(k6, (1, n_actions), jnp.float32),
    }


def ref_forward(state, p):
    """Pure-JAX reference mirroring the PyTorch forward (sample=False)."""
    h1 = jax.nn.relu(state @ p["w1"] + p["b1"])
    h2 = jax.nn.relu(h1 @ p["w2"] + p["b2"])
    out = h2 @ p["w3"] + p["b3"]
    prob = jax.nn.softmax(out, axis=1)
    logp = jax.nn.log_softmax(out, axis=1)
    action = (out >= out.max(axis=1, keepdims=True)).astype(jnp.float32)
    reg = jnp.mean(out ** 2)
    ent = -(logp * prob).sum(axis=1).mean()
    return action, logp, out, ent, reg


if __name__ == "__main__":
    # Small shapes consistent with the module:
    #   args.input_shape[agent]=32, args.policy_hidden=32, args.n_actions[agent]=8
    # Batch 64 with a 32-row tile exercises the batch grid (2 steps).
    B, D, H, A = 64, 32, 32, 8

    key = jax.random.PRNGKey(0)
    k_state, k_params = jax.random.split(key)
    state = jax.random.normal(k_state, (B, D), jnp.float32)
    params = init_params(k_params, D, H, A)

    action, log_prob, pi, entropy, reg_pi = discrete_gaussian_net(
        state, params, tb=32)
    jax.block_until_ready((action, log_prob, pi, entropy, reg_pi))

    # Correctness check vs pure-JAX reference.
    r_action, r_logp, r_pi, r_ent, r_reg = ref_forward(state, params)
    assert bool(jnp.allclose(pi, r_pi, atol=1e-5, rtol=1e-5))
    assert bool(jnp.allclose(log_prob, r_logp, atol=1e-5, rtol=1e-5))
    assert bool(jnp.allclose(action, r_action))
    assert bool(jnp.allclose(entropy, r_ent, atol=1e-5, rtol=1e-5))
    assert bool(jnp.allclose(reg_pi, r_reg, atol=1e-5, rtol=1e-5))

    print("KERNEL_OK")
</pallas_src>

<mosaic_0001>
module attributes {stable_mosaic.version = 11 : i64} {
  func.func @dgn_kernel(%arg0: i32, %arg1: memref<32x32xf32, #tpu.memory_space<vmem>>, %arg2: memref<32x32xf32, #tpu.memory_space<vmem>>, %arg3: memref<1x32xf32, #tpu.memory_space<vmem>>, %arg4: memref<32x32xf32, #tpu.memory_space<vmem>>, %arg5: memref<1x32xf32, #tpu.memory_space<vmem>>, %arg6: memref<32x128xf32, #tpu.memory_space<vmem>>, %arg7: memref<1x128xf32, #tpu.memory_space<vmem>>, %arg8: memref<32x128xf32, #tpu.memory_space<vmem>>, %arg9: memref<32x128xf32, #tpu.memory_space<vmem>>, %arg10: memref<32x128xf32, #tpu.memory_space<vmem>>, %arg11: memref<32x128xf32, #tpu.memory_space<vmem>>) attributes {dimension_semantics = [#tpu.dimension_semantics<parallel>], iteration_bounds = array<i64: 2>, scalar_prefetch = 0 : i64, scratch_operands = 0 : i64, tpu.core_type = #tpu.core_type<tc>, window_params = [{transform_indices = @transform_0, window_bounds = array<i64: 32, 32>}, {pipeline_mode = #tpu.pipeline_mode<synchronous>, transform_indices = @transform_1, window_bounds = array<i64: 32, 32>}, {pipeline_mode = #tpu.pipeline_mode<synchronous>, transform_indices = @transform_2, window_bounds = array<i64: 1, 32>}, {pipeline_mode = #tpu.pipeline_mode<synchronous>, transform_indices = @transform_3, window_bounds = array<i64: 32, 32>}, {pipeline_mode = #tpu.pipeline_mode<synchronous>, transform_indices = @transform_4, window_bounds = array<i64: 1, 32>}, {pipeline_mode = #tpu.pipeline_mode<synchronous>, transform_indices = @transform_5, window_bounds = array<i64: 32, 128>}, {pipeline_mode = #tpu.pipeline_mode<synchronous>, transform_indices = @transform_6, window_bounds = array<i64: 1, 128>}, {transform_indices = @transform_7, window_bounds = array<i64: 32, 128>}, {transform_indices = @transform_8, window_bounds = array<i64: 32, 128>}, {transform_indices = @transform_9, window_bounds = array<i64: 32, 128>}, {transform_indices = @transform_10, window_bounds = array<i64: 32, 128>}]} {
    %c0 = arith.constant 0 : index
    %c0_0 = arith.constant 0 : index
    %0 = vector.load %arg1[%c0, %c0_0] : memref<32x32xf32, #tpu.memory_space<vmem>>, vector<32x32xf32>
    %c0_1 = arith.constant 0 : index
    %c0_2 = arith.constant 0 : index
    %1 = vector.load %arg2[%c0_1, %c0_2] : memref<32x32xf32, #tpu.memory_space<vmem>>, vector<32x32xf32>
    %cst = arith.constant dense<0.000000e+00> : vector<32x32xf32>
    %2 = tpu.matmul %0, %1, %cst {dimension_numbers = #tpu.dot_dimension_numbers<[1], [0], [0], [1], [0, 0, 1, 1], [], []>} : vector<32x32xf32>, vector<32x32xf32>, vector<32x32xf32> -> vector<32x32xf32>
    %c0_3 = arith.constant 0 : index
    %c0_4 = arith.constant 0 : index
    %3 = vector.load %arg3[%c0_3, %c0_4] : memref<1x32xf32, #tpu.memory_space<vmem>>, vector<1x32xf32>
    %4 = vector.broadcast %3 : vector<1x32xf32> to vector<32x32xf32>
    %5 = arith.addf %2, %4 : vector<32x32xf32>
    %cst_5 = arith.constant 0.000000e+00 : f32
    %6 = vector.broadcast %cst_5 : f32 to vector<32x32xf32>
    %7 = arith.maximumf %5, %6 : vector<32x32xf32>
    %c0_6 = arith.constant 0 : index
    %c0_7 = arith.constant 0 : index
    %8 = vector.load %arg4[%c0_6, %c0_7] : memref<32x32xf32, #tpu.memory_space<vmem>>, vector<32x32xf32>
    %cst_8 = arith.constant dense<0.000000e+00> : vector<32x32xf32>
    %9 = tpu.matmul %7, %8, %cst_8 {dimension_numbers = #tpu.dot_dimension_numbers<[1], [0], [0], [1], [0, 0, 1, 1], [], []>} : vector<32x32xf32>, vector<32x32xf32>, vector<32x32xf32> -> vector<32x32xf32>
    %c0_9 = arith.constant 0 : index
    %c0_10 = arith.constant 0 : index
    %10 = vector.load %arg5[%c0_9, %c0_10] : memref<1x32xf32, #tpu.memory_space<vmem>>, vector<1x32xf32>
    %11 = vector.broadcast %10 : vector<1x32xf32> to vector<32x32xf32>
    %12 = arith.addf %9, %11 : vector<32x32xf32>
    %cst_11 = arith.constant 0.000000e+00 : f32
    %13 = vector.broadcast %cst_11 : f32 to vector<32x32xf32>
    %14 = arith.maximumf %12, %13 : vector<32x32xf32>
    %c0_12 = arith.constant 0 : index
    %c0_13 = arith.constant 0 : index
    %15 = vector.load %arg6[%c0_12, %c0_13] : memref<32x128xf32, #tpu.memory_space<vmem>>, vector<32x128xf32>
    %cst_14 = arith.constant dense<0.000000e+00> : vector<32x128xf32>
    %16 = tpu.matmul %14, %15, %cst_14 {dimension_numbers = #tpu.dot_dimension_numbers<[1], [0], [0], [1], [0, 0, 1, 1], [], []>} : vector<32x32xf32>, vector<32x128xf32>, vector<32x128xf32> -> vector<32x128xf32>
    %c0_15 = arith.constant 0 : index
    %c0_16 = arith.constant 0 : index
    %17 = vector.load %arg7[%c0_15, %c0_16] : memref<1x128xf32, #tpu.memory_space<vmem>>, vector<1x128xf32>
    %18 = vector.broadcast %17 : vector<1x128xf32> to vector<32x128xf32>
    %19 = arith.addf %16, %18 : vector<32x128xf32>
    %20 = tpu.iota {dimensions = array<i32: 1>} : vector<32x128xi32>
    %c8_i32 = arith.constant 8 : i32
    %21 = vector.broadcast %c8_i32 : i32 to vector<32x128xi32>
    %22 = arith.cmpi slt, %20, %21 : vector<32x128xi32>
    %cst_17 = arith.constant dense<0xFF800000> : vector<32xf32>
    %23 = vector.multi_reduction <maximumf>, %19, %cst_17 [1] : vector<32x128xf32> to vector<32xf32>
    %24 = vector.shape_cast %23 : vector<32xf32> to vector<32x1xf32>
    %25 = vector.broadcast %24 : vector<32x1xf32> to vector<32x128xf32>
    %26 = arith.subf %19, %25 : vector<32x128xf32>
    %27 = math.exp %26 : vector<32x128xf32>
    %cst_18 = arith.constant dense<0.000000e+00> : vector<32xf32>
    %28 = vector.multi_reduction <add>, %27, %cst_18 [1] : vector<32x128xf32> to vector<32xf32>
    %29 = vector.shape_cast %28 : vector<32xf32> to vector<32x1xf32>
    %30 = tpu.reciprocal %29 : vector<32x1xf32> -> vector<32x1xf32>
    %31 = vector.broadcast %30 : vector<32x1xf32> to vector<32x128xf32>
    %32 = arith.mulf %27, %31 : vector<32x128xf32>
    %33 = math.log %29 : vector<32x1xf32>
    %34 = vector.broadcast %33 : vector<32x1xf32> to vector<32x128xf32>
    %35 = arith.subf %26, %34 : vector<32x128xf32>
    %c0_19 = arith.constant 0 : index
    %c0_20 = arith.constant 0 : index
    %36 = vector.load %arg8[%c0_19, %c0_20] : memref<32x128xf32, #tpu.memory_space<vmem>>, vector<32x128xf32>
    tpu.vector_store %arg8[%c0_19, %c0_20], %19 {strides = array<i32>} : memref<32x128xf32, #tpu.memory_space<vmem>>, vector<32x128xf32>,
    %c0_21 = arith.constant 0 : index
    %c0_22 = arith.constant 0 : index
    %37 = vector.load %arg9[%c0_21, %c0_22] : memref<32x128xf32, #tpu.memory_space<vmem>>, vector<32x128xf32>
    tpu.vector_store %arg9[%c0_21, %c0_22], %35 {strides = array<i32>} : memref<32x128xf32, #tpu.memory_space<vmem>>, vector<32x128xf32>,
    %38 = vector.broadcast %24 : vector<32x1xf32> to vector<32x128xf32>
    %39 = arith.cmpf oge, %19, %38 : vector<32x128xf32>
    %40 = arith.extui %39 : vector<32x128xi1> to vector<32x128xi32>
    %41 = arith.sitofp %40 : vector<32x128xi32> to vector<32x128xf32>
    %c0_23 = arith.constant 0 : index
    %c0_24 = arith.constant 0 : index
    %42 = vector.load %arg10[%c0_23, %c0_24] : memref<32x128xf32, #tpu.memory_space<vmem>>, vector<32x128xf32>
    tpu.vector_store %arg10[%c0_23, %c0_24], %41 {strides = array<i32>} : memref<32x128xf32, #tpu.memory_space<vmem>>, vector<32x128xf32>,
    %cst_25 = arith.constant 0.000000e+00 : f32
    %43 = vector.broadcast %cst_25 : f32 to vector<32x128xf32>
    %44 = arith.select %22, %19, %43 : vector<32x128xi1>, vector<32x128xf32>
    %45 = arith.mulf %44, %44 : vector<32x128xf32>
    %cst_26 = arith.constant dense<0.000000e+00> : vector<32xf32>
    %46 = vector.multi_reduction <add>, %45, %cst_26 [1] : vector<32x128xf32> to vector<32xf32>
    %47 = vector.shape_cast %46 : vector<32xf32> to vector<32x1xf32>
    %48 = arith.mulf %35, %32 : vector<32x128xf32>
    %cst_27 = arith.constant 0.000000e+00 : f32
    %49 = vector.broadcast %cst_27 : f32 to vector<32x128xf32>
    %50 = arith.select %22, %48, %49 : vector<32x128xi1>, vector<32x128xf32>
    %cst_28 = arith.constant dense<0.000000e+00> : vector<32xf32>
    %51 = vector.multi_reduction <add>, %50, %cst_28 [1] : vector<32x128xf32> to vector<32xf32>
    %52 = vector.shape_cast %51 : vector<32xf32> to vector<32x1xf32>
    %cst_29 = arith.constant 0.000000e+00 : f32
    %53 = vector.broadcast %cst_29 : f32 to vector<32x1xf32>
    %54 = arith.subf %53, %52 : vector<32x1xf32>
    %c0_i32 = arith.constant 0 : i32
    %55 = vector.broadcast %c0_i32 : i32 to vector<32x128xi32>
    %56 = arith.cmpi eq, %20, %55 : vector<32x128xi32>
    %cst_30 = arith.constant 0.000000e+00 : f32
    %57 = vector.shape_cast %47 : vector<32x1xf32> to vector<32x1xf32>
    %58 = vector.broadcast %57 : vector<32x1xf32> to vector<32x128xf32>
    %59 = vector.broadcast %cst_30 : f32 to vector<32x128xf32>
    %60 = arith.select %56, %58, %59 : vector<32x128xi1>, vector<32x128xf32>
    %c1_i32 = arith.constant 1 : i32
    %61 = vector.broadcast %c1_i32 : i32 to vector<32x128xi32>
    %62 = arith.cmpi eq, %20, %61 : vector<32x128xi32>
    %cst_31 = arith.constant 0.000000e+00 : f32
    %63 = vector.shape_cast %54 : vector<32x1xf32> to vector<32x1xf32>
    %64 = vector.broadcast %63 : vector<32x1xf32> to vector<32x128xf32>
    %65 = vector.broadcast %cst_31 : f32 to vector<32x128xf32>
    %66 = arith.select %62, %64, %65 : vector<32x128xi1>, vector<32x128xf32>
    %67 = arith.addf %60, %66 : vector<32x128xf32>
    %c0_32 = arith.constant 0 : index
    %c0_33 = arith.constant 0 : index
    %68 = vector.load %arg11[%c0_32, %c0_33] : memref<32x128xf32, #tpu.memory_space<vmem>>, vector<32x128xf32>
    tpu.vector_store %arg11[%c0_32, %c0_33], %67 {strides = array<i32>} : memref<32x128xf32, #tpu.memory_space<vmem>>, vector<32x128xf32>,
    return
  }
  func.func @transform_0(%arg0: i32) -> (i32, i32) {
    %c0_i32 = arith.constant 0 : i32
    %c0_i32_0 = arith.constant 0 : i32
    return %arg0, %c0_i32 : i32, i32
  }
  func.func @transform_1(%arg0: i32) -> (i32, i32) {
    %c0_i32 = arith.constant 0 : i32
    %c0_i32_0 = arith.constant 0 : i32
    %c0_i32_1 = arith.constant 0 : i32
    return %c0_i32, %c0_i32_0 : i32, i32
  }
  func.func @transform_2(%arg0: i32) -> (i32, i32) {
    %c0_i32 = arith.constant 0 : i32
    %c0_i32_0 = arith.constant 0 : i32
    %c0_i32_1 = arith.constant 0 : i32
    return %c0_i32, %c0_i32_0 : i32, i32
  }
  func.func @transform_3(%arg0: i32) -> (i32, i32) {
    %c0_i32 = arith.constant 0 : i32
    %c0_i32_0 = arith.constant 0 : i32
    %c0_i32_1 = arith.constant 0 : i32
    return %c0_i32, %c0_i32_0 : i32, i32
  }
  func.func @transform_4(%arg0: i32) -> (i32, i32) {
    %c0_i32 = arith.constant 0 : i32
    %c0_i32_0 = arith.constant 0 : i32
    %c0_i32_1 = arith.constant 0 : i32
    return %c0_i32, %c0_i32_0 : i32, i32
  }
  func.func @transform_5(%arg0: i32) -> (i32, i32) {
    %c0_i32 = arith.constant 0 : i32
    %c0_i32_0 = arith.constant 0 : i32
    %c0_i32_1 = arith.constant 0 : i32
    return %c0_i32, %c0_i32_0 : i32, i32
  }
  func.func @transform_6(%arg0: i32) -> (i32, i32) {
    %c0_i32 = arith.constant 0 : i32
    %c0_i32_0 = arith.constant 0 : i32
    %c0_i32_1 = arith.constant 0 : i32
    return %c0_i32, %c0_i32_0 : i32, i32
  }
  func.func @transform_7(%arg0: i32) -> (i32, i32) {
    %c0_i32 = arith.constant 0 : i32
    %c0_i32_0 = arith.constant 0 : i32
    return %arg0, %c0_i32 : i32, i32
  }
  func.func @transform_8(%arg0: i32) -> (i32, i32) {
    %c0_i32 = arith.constant 0 : i32
    %c0_i32_0 = arith.constant 0 : i32
    return %arg0, %c0_i32 : i32, i32
  }
  func.func @transform_9(%arg0: i32) -> (i32, i32) {
    %c0_i32 = arith.constant 0 : i32
    %c0_i32_0 = arith.constant 0 : i32
    return %arg0, %c0_i32 : i32, i32
  }
  func.func @transform_10(%arg0: i32) -> (i32, i32) {
    %c0_i32 = arith.constant 0 : i32
    %c0_i32_0 = arith.constant 0 : i32
    return %arg0, %c0_i32 : i32, i32
  }
}

</mosaic_0001>

<bundles_post_ra>
// kernel: tpu_custom_call.1
= control target key start
LH: loop header
LB: loop body
LE: loop exit
PB: predicated region body
PF: predicated region fallthrough
CT: control target
= control target key end

     0   :  { %s1653_s0 = inlined_call_operand.vmem [shape: f32[64,32], index: 0, kind: input, shape index: {}]   ;;  %s1654_s1 = inlined_call_operand.vmem [shape: f32[32,32], index: 1, kind: input, shape index: {}]   ;;  %s1655_s2 = inlined_call_operand.vmem [shape: f32[1,32], index: 2, kind: input, shape index: {}]   ;;  %s1656_s3 = inlined_call_operand.vmem [shape: f32[32,32], index: 3, kind: input, shape index: {}]   ;;  %s1657_s4 = inlined_call_operand.vmem [shape: f32[1,32], index: 4, kind: input, shape index: {}]   ;;  %s1658_s5 = inlined_call_operand.vmem [shape: f32[32,128], index: 5, kind: input, shape index: {}]   ;;  %s1659_s6 = inlined_call_operand.vmem [shape: f32[1,128], index: 6, kind: input, shape index: {}]   ;;  %s1660_s7 = inlined_call_operand.hbm [shape: f32[64,128], index: 7, kind: output, shape index: {0}]   ;;  %s1661_s8 = inlined_call_operand.hbm [shape: f32[64,128], index: 8, kind: output, shape index: {1}]   ;;  %s1662_s9 = inlined_call_operand.hbm [shape: f32[64,128], index: 9, kind: output, shape index: {2}]   ;;  %s1663_s10 = inlined_call_operand.hbm [shape: f32[64,128], index: 10, kind: output, shape index: {3}]  }
   0x1   :  { %1665 = sst [smem:[#allocation13_spill]] %s1653_s0 }
   0x2   :  { %1666 = sst [smem:[#allocation14_spill]] %s1654_s1 }
   0x3   :  { %1667 = sst [smem:[#allocation15_spill]] %s1655_s2 }
   0x4   :  { %1668 = sst [smem:[#allocation16_spill]] %s1656_s3 }
   0x5   :  { %1669 = sst [smem:[#allocation17_spill]] %s1657_s4 }
   0x6   :  { %1670 = sst [smem:[#allocation18_spill]] %s1658_s5 }
   0x7   :  { %1671 = sst [smem:[#allocation19_spill]] %s1659_s6 }
   0x8   :  { %1672 = sst [smem:[#allocation20_spill]] %s1661_s8 }
   0x9   :  { %16 = vsyncpa [#allocation3], 0 }
   0xa   :  { %18 = vsyncpa [#allocation3 + $0x1], 0 }
   0xb   :  { %19 = vsyncpa [#allocation5], 0 }
   0xc   :  { %21 = vsyncpa [#allocation5 + $0x1], 0 }
   0xd   :  { %22 = vsyncpa [#allocation8], 0 }
   0xe   :  { %24 = vsyncpa [#allocation8 + $0x1], 0  ;;  %s1327_s13 = smov 0   ;;  %s1329_s14 = smov 0  }
   0xf   :  { %s1331_s15 = smov 0   ;;  %s1333_s16 = smov 0  }
  0x10 LB: > { %s1348_s17 = sadd.s32 4294967295, %s1267_s16   ;;  %s1664_s18 = sadd.s32 4294967294, %s1267_s16   ;;  %s1267_s16 = sphi %s1333_s16, %s1690_s16   ;;  %s1263_s15 = sphi %s1331_s15, %s1689_s15   ;;  %s1259_s14 = sphi %s1329_s14, %s1688_s14   ;;  %s1255_s13 = sphi %s1327_s13, %s1687_s13  }
  0x11   : > { %s1352_s19 = sadd.s32 1, %s1267_s16   ;;  %s189_s20 = sadd.s32 1, %s1263_s15 }
  0x12   : > { %s186_s21 = ssub.s32 %s1267_s16, %s1352_s19  ;;  %p199_p0 = scmp.ne.s32.totalorder %s1263_s15, %s1259_s14 }
  0x13   : > { %p187_p1 = scmp.eq.s32.totalorder %s186_s21, 0  ;;  %p200_p2 = scmp.eq.s32.totalorder %s1348_s17, 1 }
  0x14   : > { %p205_p3 = scmp.ne.s32.totalorder %s1259_s14, %s1255_s13  ;;  %p206_p4 = scmp.eq.s32.totalorder %s1664_s18, 1 }
  0x15   : > { %s1365_s22 = scalar_select %p187_p1, %s1263_s15, %s189_s20  }
  0x16   : > { %p1367_p5 = por %p200_p2, %p199_p0  ;;  %p1371_p6 = por %p206_p4, %p205_p3 }
  0x17   : > { %1673 = sst [smem:[#allocation12_spill]] %s1365_s22  ;;  %p976_p7 = scmp.ge.s32.totalorder %s1267_s16, 1 }
  0x18   : > { %p329_p8 = scmp.lt.s32.totalorder %s1267_s16, 3 }
  0x1a   : > { %p330_p9 = pnand %p976_p7, %p329_p8 }
  0x1b   : > { %s1676_s1 = sld [smem:[#allocation14_spill]] (!%p330_p9)  ;;  %s981_s29 = sshll.u32 (!%p330_p9), %s1348_s17, 2 }
  0x1c   : > { %333 = sbr.rel (%p330_p9) target bundleno = 862 (0x35e), region = 48  ;;  %p383_p10 = scmp.lt.s32.totalorder (!%p330_p9), %s981_s29, 7 }
  0x1d   : > { %s1677_s3 = sld [smem:[#allocation16_spill]] (!%p330_p9)  ;;  %s1436_s28 = sand.u32 (!%p330_p9), 1, %s1259_s14  }
  0x1e   : > { %s1678_s0 = sld [smem:[#allocation13_spill]] (!%p330_p9)  ;;  %s1442_s11 = sshll.u32 (!%p330_p9), %s1436_s28, 5 }
  0x1f   : > { %s1679_s5 = sld [smem:[#allocation18_spill]] (!%p330_p9)  ;;  %s1445_s12 = scalar_lea.vmem (!%p330_p9), [#allocation2], %s1442_s11 }
  0x20   : > { %s1680_s2 = sld [smem:[#allocation15_spill]] (!%p330_p9)  ;;  %s1464_s20 = scalar_lea.vmem (!%p330_p9), [#allocation6], %s1442_s11 }
  0x21   : > { %v399_v0 = vld [vmem:[%s1676_s1 + $0x18] sm:$0xff]  ;;  %v398_v1 = vld [vmem:[%s1676_s1 + $0x10] sm:$0xff]  ;;  %v397_v3 = vld [vmem:[%s1676_s1 + $0x8] sm:$0xff]  ;;  %s1692_s29 = smov (!%p383_p10, %s981_s29), 7  ;;  %vm404_vm0 = vcmask 261120   ;;  %s1681_s4 = sld [smem:[#allocation17_spill]] }
  0x22   : > { %429 = vmatpush.msra.mxu0 %v399_v0  ;;  %1017 = vmatpush.msra.mxu3 %v399_v0  ;;  %v396_v4 = vld [vmem:[%s1676_s1] sm:$0xff]  ;;  %s982_s26 = sshll.u32 %s1692_s29, 3  ;;  %s1682_s6 = sld [smem:[#allocation19_spill]]  ;;  %v1269_v53 = vmov 0.0  }
  0x23   : > { %v453_v2 = vld [vmem:[%s1677_s3 + $0x18] sm:$0xff]  ;;  %v452_v9 = vld [vmem:[%s1677_s3 + $0x10] sm:$0xff]  ;;  %v451_v10 = vld [vmem:[%s1677_s3 + $0x8] sm:$0xff]  ;;  %s1500_s21 = scalar_lea.vmem [#allocation4], %s1442_s11  ;;  %s1527_s27 = sshll.u32 %s1348_s17, 5 }
  0x24   : > { %1021 = vmatpush.msra.mxu1 %v453_v2  ;;  %430 = vmatpush.msra.mxu0 %v398_v1  ;;  %s386_s30 = scalar_lea.vmem %s1678_s0, %s982_s26  ;;  %v450_v11 = vld [vmem:[%s1677_s3] sm:$0xff]  ;;  %s778_s25 = sshll.u32 %s1500_s21, 4  ;;  %s1529_s25 = int_to_ptr.vmem [resolvable:$true] %s778_s25 }
  0x25   : > { %1018 = vmatpush.msra.mxu3 %v398_v1  ;;  %v392_v5 = vld [vmem:[%s386_s30] sm:$0xff]  ;;  %v393_v6 = vld [vmem:[%s386_s30 + $0x8] sm:$0xff]  ;;  %v394_v7 = vld [vmem:[%s386_s30 + $0x10] sm:$0xff]  ;;  %s1683_s8 = sld [smem:[#allocation20_spill]]  ;;  %s738_s18 = sand.u32 1, %s1348_s17  }
  0x26   : > { %431 = vmatpush.msra.mxu0 %v397_v3  ;;  %v395_v8 = vld [vmem:[%s386_s30 + $0x18] sm:$0xff]  ;;  %1022 = vmatpush.msra.mxu1 %v452_v9  ;;  %v1086_v13 = vld [vmem:[%s1680_s2] ss:$0 sm:$0xff]  ;;  %v505_v26 = vld [vmem:[%s1679_s5 + $0x10] sm:$0xff]  ;;  %s760_s2 = scalar_lea.hbm %s1660_s7, %s1527_s27  ;;  %s1545_s3 = scalar_lea.sflag [#allocation5], %s738_s18 }
  0x27   : > { %1019 = vmatpush.msra.mxu3 %v397_v3  ;;  %v506_v12 = vld [vmem:[%s1679_s5 + $0x18] sm:$0xff]  ;;  %v504_v27 = vld [vmem:[%s1679_s5 + $0x8] sm:$0xff]  ;;  %v503_v28 = vld [vmem:[%s1679_s5] sm:$0xff] }
  0x28   : > { %432 = vmatpush.msra.mxu0 %v396_v4  ;;  %1023 = vmatpush.msra.mxu1 %v451_v10  ;;  %v1087_v29 = vld [vmem:[%s1681_s4] ss:$0 sm:$0xff] }
  0x29   : > { %1020 = vmatpush.msra.mxu3 %v396_v4  ;;  %983 = vmatmul.msk.f32.vlgmr.msra.gmra.mxu0 %vm404_vm0, %v392_v5  ;;  %v1088_v42 = vld [vmem:[%s1682_s6] ss:$0 sm:$0xff] }
  0x2a   : > { %984 = vmatmul.msk.f32.vlgmr.msra.gmra.mxu3 %vm404_vm0, %v393_v6  ;;  %482 = vmatpush.msrb.mxu0 %v453_v2  ;;  %v552_v2 = vlaneseq }
  0x2b   : > { %1024 = vmatpush.msra.mxu1 %v450_v11  ;;  %1025 = vmatpush.msra.mxu2 %v506_v12  ;;  %s1133_s4 = scalar_lea.hbm %s1683_s8, 64 }
  0x2c   : > { %483 = vmatpush.msrb.mxu0 %v452_v9  ;;  %v1486_v6 = vand.u32 127, %v552_v2 }
  0x2d   : > { %1026 = vmatpush.msra.mxu2 %v505_v26 }
  0x2e   : > { %484 = vmatpush.msrb.mxu0 %v451_v10  ;;  %vm554_vm5 = vcmp.lt.s32.totalorder %v1486_v6, 8 }
  0x2f   : > { %1027 = vmatpush.msra.mxu2 %v504_v27 }
  0x30   : > { %485 = vmatpush.msrb.mxu0 %v450_v11 }
  0x31   : > { %1028 = vmatpush.msra.mxu2 %v503_v28 }
  0x32   : > { %985 = vmatmul.msk.f32.gmra.mxu3 %vm404_vm0, %v394_v7  ;;  %535 = vmatpush.msra.mxu0 %v506_v12 }
  0x34   : > { %536 = vmatpush.msra.mxu0 %v505_v26 }
  0x36   : > { %537 = vmatpush.msra.mxu0 %v504_v27 }
  0x38   : > { %538 = vmatpush.msra.mxu0 %v503_v28 }
  0x3a   : > { %986 = vmatmul.msk.f32.gmra.mxu3 %vm404_vm0, %v395_v8 }
  0xa6   : > { %v434_v14 = vpop.f32.mrf.mxu0 }
  0xa7   : > { %v435_v15 = vadd.f32 %v1086_v13, %v434_v14 }
  0xa9   : > { %v446_v16 = vmax.f32 %v435_v15, 0.0 }
  0xab   : > { %987 = vmatmul.msk.f32.vlgmr.msrb.gmra.mxu0 %vm404_vm0, %v446_v16 }
  0xad   : > { %v437_v17 = vpop.f32.mrf.mxu3 }
  0xae   : > { %v438_v18 = vadd.f32 %v1086_v13, %v437_v17 }
  0xb0   : > { %v447_v19 = vmax.f32 %v438_v18, 0.0 }
  0xb2   : > { %988 = vmatmul.msk.f32.vlgmr.msra.gmra.mxu1 %vm404_vm0, %v447_v19 }
  0xb5   : > { %v440_v20 = vpop.f32.mrf.mxu3 }
  0xb6   : > { %v441_v21 = vadd.f32 %v1086_v13, %v440_v20 }
  0xb8   : > { %v448_v22 = vmax.f32 %v441_v21, 0.0 }
  0xba   : > { %989 = vmatmul.msk.f32.gmra.mxu1 %vm404_vm0, %v448_v22 }
  0xbd   : > { %v443_v23 = vpop.f32.mrf.mxu3 }
  0xbe   : > { %v444_v24 = vadd.f32 %v1086_v13, %v443_v23 }
  0xc0   : > { %v449_v25 = vmax.f32 %v444_v24, 0.0 }
  0xc2   : > { %990 = vmatmul.msk.f32.gmra.mxu1 %vm404_vm0, %v449_v25 }
 0x128   : > { %v487_v30 = vpop.f32.mrf.mxu0 }
 0x129   : > { %v488_v31 = vadd.f32 %v1087_v29, %v487_v30 }
 0x12b   : > { %v499_v32 = vmax.f32 %v488_v31, 0.0 }
 0x12d   : > { %991 = vmatmul.msk.f32.vlgmr.msra.gmra.mxu0 %vm404_vm0, %v499_v32 }
 0x12f   : > { %v490_v33 = vpop.f32.mrf.mxu1 }
 0x130   : > { %v491_v34 = vadd.f32 %v1087_v29, %v490_v33 }
 0x132   : > { %v500_v35 = vmax.f32 %v491_v34, 0.0 }
 0x134   : > { %992 = vmatmul.msk.f32.vlgmr.msra.gmra.mxu2 %vm404_vm0, %v500_v35 }
 0x137   : > { %v493_v36 = vpop.f32.mrf.mxu1 }
 0x138   : > { %v494_v37 = vadd.f32 %v1087_v29, %v493_v36 }
 0x13a   : > { %v501_v38 = vmax.f32 %v494_v37, 0.0 }
 0x13c   : > { %993 = vmatmul.msk.f32.gmra.mxu2 %vm404_vm0, %v501_v38 }
 0x13f   : > { %v496_v39 = vpop.f32.mrf.mxu1 }
 0x140   : > { %v497_v40 = vadd.f32 %v1087_v29, %v496_v39 }
 0x142   : > { %v502_v41 = vmax.f32 %v497_v40, 0.0 }
 0x144   : > { %994 = vmatmul.msk.f32.gmra.mxu2 %vm404_vm0, %v502_v41 }
 0x1aa   : > { %v540_v43 = vpop.f32.mrf.mxu0 }
 0x1ab   : > { %v541_v44 = vadd.f32 %v1088_v42, %v540_v43 }
 0x1ad   : > { %655 = vst [vmem:[%s1445_s12] sm:$0xff] %v541_v44  ;;  %555 = vmax.xlane.f32.xlu0 %v541_v44  ;;  %v679_v9 = vsel %vm554_vm5, %v541_v44, 0.0 }
 0x1ae   : > { %v683_v10 = vmul.f32 %v679_v9, %v679_v9 }
 0x1b7   : > { %v543_v45 = vpop.f32.mrf.mxu2 }
 0x1b8   : > { %v1448_v46 = vadd.f32 %v1088_v42, %v543_v45 }
 0x1ba   : > { %656 = vst [vmem:[%s1445_s12 + $0x8] sm:$0xff] %v1448_v46  ;;  %557 = vmax.xlane.f32.xlu0 %v1448_v46 }
 0x1bf   : > { %v546_v47 = vpop.f32.mrf.mxu2 }
 0x1c0   : > { %v1453_v48 = vadd.f32 %v1088_v42, %v546_v47 }
 0x1c2   : > { %657 = vst [vmem:[%s1445_s12 + $0x10] sm:$0xff] %v1453_v48  ;;  %559 = vmax.xlane.f32.xlu1 %v1453_v48 }
 0x1c7   : > { %v549_v49 = vpop.f32.mrf.mxu2 }
 0x1c8   : > { %v1458_v50 = vadd.f32 %v1088_v42, %v549_v49 }
 0x1ca   : > { %658 = vst [vmem:[%s1445_s12 + $0x18] sm:$0xff] %v1458_v50  ;;  %561 = vmax.xlane.f32.xlu1 %v1458_v50 }
 0x220   : > { %v556_v51 = vpop.xlane.xlu0 %555 }
 0x221   : > { %v563_v52 = vsub.f32 %v541_v44, %v556_v51  ;;  %vm663_vm1 = vcmp.ge.f32.partialorder %v541_v44, %v556_v51 }
 0x222   : > { %v995_v54 = vsel %vm663_vm1, 1.0, %v1269_v53 }
 0x223   : > { %v567_v55 = vmul.f32 1.442695, %v563_v52  ;;  %675 = vst [vmem:[%s1464_s20] sm:$0xff] %v995_v54 }
 0x225   : > { %1089 = vpow2.f32 %v567_v55 }
 0x22b   : > { %v1090_v56 = vpop.eup %1089 }
 0x22c   : > { %575 = vadd.xlane.f32.xlu2 %v1090_v56 }
 0x22d   : > { %v558_v57 = vpop.xlane.xlu0 %557 }
 0x22e   : > { %v1468_v58 = vsub.f32 %v1448_v46, %v558_v57  ;;  %vm664_vm2 = vcmp.ge.f32.partialorder %v1448_v46, %v558_v57 }
 0x22f   : > { %v996_v59 = vsel %vm664_vm2, 1.0, %v1269_v53 }
 0x230   : > { %v569_v60 = vmul.f32 1.442695, %v1468_v58  ;;  %676 = vst [vmem:[%s1464_s20 + $0x8] sm:$0xff] %v996_v59 }
 0x232   : > { %1091 = vpow2.f32 %v569_v60 }
 0x235   : > { %v560_v61 = vpop.xlane.xlu1 %559 }
 0x236   : > { %v1474_v62 = vsub.f32 %v1453_v48, %v560_v61  ;;  %vm665_vm3 = vcmp.ge.f32.partialorder %v1453_v48, %v560_v61 }
 0x237   : > { %v997_v63 = vsel %vm665_vm3, 1.0, %v1269_v53 }
 0x238   : > { %v1477_v0 = vpop.eup %1091  ;;  %v571_v1 = vmul.f32 1.442695, %v1474_v62  ;;  %677 = vst [vmem:[%s1464_s20 + $0x10] sm:$0xff] %v997_v63 }
 0x239   : > { %577 = vadd.xlane.f32.xlu2 %v1477_v0 }
 0x23a   : > { %1093 = vpow2.f32 %v571_v1 }
 0x23d   : > { %v562_v3 = vpop.xlane.xlu1 %561 }
 0x23e   : > { %v1483_v4 = vsub.f32 %v1458_v50, %v562_v3  ;;  %vm666_vm4 = vcmp.ge.f32.partialorder %v1458_v50, %v562_v3 }
 0x23f   : > { %v998_v5 = vsel %vm666_vm4, 1.0, %v1269_v53 }
 0x240   : > { %v1488_v7 = vpop.eup %1093  ;;  %v573_v8 = vmul.f32 1.442695, %v1483_v4  ;;  %678 = vst [vmem:[%s1464_s20 + $0x18] sm:$0xff] %v998_v5 }
 0x241   : > { %579 = vadd.xlane.f32.xlu0 %v1488_v7 }
 0x242   : > { %1095 = vpow2.f32 %v573_v8  ;;  %v682_v8 = vsel %vm554_vm5, %v1458_v50, 0.0 }
 0x248   : > { %v1496_v11 = vpop.eup %1095 }
 0x249   : > { %581 = vadd.xlane.f32.xlu1 %v1496_v11  ;;  %687 = vadd.xlane.f32.xlu0 %v683_v10 }
 0x29f   : > { %v576_v12 = vpop.xlane.xlu2 %575 }
 0x2a0   : > { %1097 = vrcp.f32 %v576_v12  ;;  %v594_v18 = vand.u32 2147483648, %v576_v12  ;;  %v592_v22 = vand.u32 2147483647, %v576_v12  ;;  %vm588_vm7 = vweird.f32 %v576_v12 }
 0x2a1   : > { %1099 = vlog2.f32 %v576_v12 }
 0x2a2   : > { %v595_v24 = vor.u32 1.1754944e-38, %v594_v18  ;;  %vm593_vm9 = vcmp.eq.f32.partialorder %v592_v22, 8.507059e+37 }
 0x2a6   : > { %v1098_v13 = vpop.eup %1097 }
 0x2a7   : > { %v1100_v14 = vpop.eup %1099  ;;  %v584_v15 = vmul.f32 %v1098_v13, %v576_v12  ;;  %vm589_vm6 = vweird.f32 %v1098_v13 }
 0x2a8   : > { %v644_v16 = vmul.f32 0.6931472, %v1100_v14  ;;  %vm590_vm8 = vmor %vm588_vm7, %vm589_vm6 }
 0x2a9   : > { %v585_v17 = vsub.f32 1.0, %v584_v15 }
 0x2aa   : > { %v651_v19 = vsub.f32 %v563_v52, %v644_v16  ;;  %v686_v16 = vmul.f32 %v682_v8, %v682_v8 }
 0x2ab   : > { %v586_v21 = vmul.f32 %v1098_v13, %v585_v17 }
 0x2ac   : > { %v578_v20 = vpop.xlane.xlu2 %577  ;;  %659 = vst [vmem:[%s1500_s21] sm:$0xff] %v651_v19 }
 0x2ad   : > { %1101 = vrcp.f32 %v578_v20  ;;  %v587_v23 = vadd.f32 %v1098_v13, %v586_v21  ;;  %v608_v36 = vand.u32 2147483648, %v578_v20  ;;  %v606_v39 = vand.u32 2147483647, %v578_v20 }
 0x2ae   : > { %1103 = vlog2.f32 %v578_v20  ;;  %vm602_vm11 = vweird.f32 %v578_v20 }
 0x2af   : > { %v591_v25 = vsel %vm590_vm8, %v1098_v13, %v587_v23  ;;  %v609_v42 = vor.u32 1.1754944e-38, %v608_v36  ;;  %vm607_vm13 = vcmp.eq.f32.partialorder %v606_v39, 8.507059e+37 }
 0x2b0   : > { %v596_v26 = vsel %vm593_vm9, %v595_v24, %v591_v25 }
 0x2b1   : > { %v639_v27 = vmul.f32 %v1090_v56, %v596_v26 }
 0x2b3   : > { %v1102_v28 = vpop.eup %1101  ;;  %v695_v32 = vmul.f32 %v651_v19, %v639_v27 }
 0x2b4   : > { %v1104_v29 = vpop.eup %1103  ;;  %v598_v30 = vmul.f32 %v1102_v28, %v578_v20  ;;  %v580_v31 = vpop.xlane.xlu0 %579  ;;  %vm603_vm10 = vweird.f32 %v1102_v28  ;;  %v680_v20 = vsel %vm554_vm5, %v1448_v46, 0.0  ;;  %v681_v46 = vsel %vm554_vm5, %v1453_v48, 0.0 }
 0x2b5   : > { %1105 = vrcp.f32 %v580_v31  ;;  %v646_v33 = vmul.f32 0.6931472, %v1104_v29  ;;  %v699_v35 = vsel %vm554_vm5, %v695_v32, 0.0  ;;  %vm604_vm12 = vmor %vm602_vm11, %vm603_vm10  ;;  %v622_v54 = vand.u32 2147483648, %v580_v31 }
 0x2b6   : > { %v599_v34 = vsub.f32 1.0, %v598_v30  ;;  %1107 = vlog2.f32 %v580_v31  ;;  %703 = vadd.xlane.f32.xlu2 %v699_v35  ;;  %vm616_vm15 = vweird.f32 %v580_v31  ;;  %v684_v22 = vmul.f32 %v680_v20, %v680_v20 }
 0x2b7   : > { %v652_v37 = vsub.f32 %v1468_v58, %v646_v33  ;;  %v620_v58 = vand.u32 2147483647, %v580_v31  ;;  %v623_v63 = vor.u32 1.1754944e-38, %v622_v54 }
 0x2b8   : > { %v600_v38 = vmul.f32 %v1102_v28, %v599_v34 }
 0x2b9   : > { %660 = vst [vmem:[%s1500_s21 + $0x8] sm:$0xff] %v652_v37  ;;  %vm621_vm1 = vcmp.eq.f32.partialorder %v620_v58, 8.507059e+37 }
 0x2ba   : > { %v601_v40 = vadd.f32 %v1102_v28, %v600_v38 }
 0x2bb   : > { %v1106_v41 = vpop.eup %1105 }
 0x2bc   : > { %v1108_v43 = vpop.eup %1107  ;;  %v612_v44 = vmul.f32 %v1106_v41, %v580_v31  ;;  %v582_v45 = vpop.xlane.xlu1 %581  ;;  %v605_v47 = vsel %vm604_vm12, %v1102_v28, %v601_v40  ;;  %vm617_vm14 = vweird.f32 %v1106_v41 }
 0x2bd   : > { %1109 = vrcp.f32 %v582_v45  ;;  %v610_v49 = vsel %vm607_vm13, %v609_v42, %v605_v47  ;;  %v648_v51 = vmul.f32 0.6931472, %v1108_v43  ;;  %vm618_vm0 = vmor %vm616_vm15, %vm617_vm14  ;;  %v634_v10 = vand.u32 2147483647, %v582_v45 }
 0x2be   : > { %v613_v52 = vsub.f32 1.0, %v612_v44  ;;  %v640_v53 = vmul.f32 %v1477_v0, %v610_v49  ;;  %1111 = vlog2.f32 %v582_v45  ;;  %v636_v12 = vand.u32 2147483648, %v582_v45 }
 0x2bf   : > { %v653_v55 = vsub.f32 %v1474_v62, %v648_v51  ;;  %vm630_vm3 = vweird.f32 %v582_v45  ;;  %vm635_vm6 = vcmp.eq.f32.partialorder %v634_v10, 8.507059e+37 }
 0x2c0   : > { %v696_v56 = vmul.f32 %v652_v37, %v640_v53  ;;  %v614_v57 = vmul.f32 %v1106_v41, %v613_v52  ;;  %v637_v50 = vor.u32 1.1754944e-38, %v636_v12 }
 0x2c1   : > { %661 = vst [vmem:[%s1500_s21 + $0x10] sm:$0xff] %v653_v55 }
 0x2c2   : > { %v700_v59 = vsel %vm554_vm5, %v696_v56, 0.0  ;;  %v615_v60 = vadd.f32 %v1106_v41, %v614_v57 }
 0x2c3   : > { %v1110_v61 = vpop.eup %1109  ;;  %705 = vadd.xlane.f32.xlu0 %v700_v59 }
 0x2c4   : > { %v626_v1 = vmul.f32 %v1110_v61, %v582_v45  ;;  %v619_v0 = vsel %vm618_vm0, %v1106_v41, %v615_v60  ;;  %v1112_v2 = vpop.eup %1111  ;;  %vm631_vm2 = vweird.f32 %v1110_v61 }
 0x2c5   : > { %v624_v62 = vsel %vm621_vm1, %v623_v63, %v619_v0  ;;  %v650_v9 = vmul.f32 0.6931472, %v1112_v2  ;;  %vm632_vm4 = vmor %vm630_vm3, %vm631_vm2 }
 0x2c6   : > { %v627_v3 = vsub.f32 1.0, %v626_v1  ;;  %v641_v5 = vmul.f32 %v1488_v7, %v624_v62 }
 0x2c7   : > { %v654_v15 = vsub.f32 %v1483_v4, %v650_v9 }
 0x2c8   : > { %v697_v13 = vmul.f32 %v653_v55, %v641_v5  ;;  %v628_v14 = vmul.f32 %v1110_v61, %v627_v3 }
 0x2c9   : > { %662 = vst [vmem:[%s1500_s21 + $0x18] sm:$0xff] %v654_v15  ;;  %s777_s21 = scalar_lea.hbm %s1683_s8, %s1527_s27 }
 0x2ca   : > { %v701_v17 = vsel %vm554_vm5, %v697_v13, 0.0  ;;  %v629_v7 = vadd.f32 %v1110_v61, %v628_v14  ;;  %s780_s26 = sshll.u32 %s777_s21, 4  ;;  %s781_s26 = int_to_ptr.hbm [resolvable:$true] %s780_s26 }
 0x2cb   : > { %707 = vadd.xlane.f32.xlu1 %v701_v17  ;;  %693 = vadd.xlane.f32.xlu0 %v686_v16  ;;  %s1127_s30 = sshra.s32 %s781_s26, 4  ;;  %s1128_s30 = int_to_ptr.hbm [resolvable:$true] %s1127_s30 }
 0x2cc   : > { %v633_v18 = vsel %vm632_vm4, %v1110_v61, %v629_v7  ;;  %s1129_s29 = scalar_lea.hbm %s1128_s30, 32  ;;  %p1134_p0 = scmp.lt.s32.totalorder %s1128_s30, %s1683_s8 }
 0x2cd   : > { %v638_v19 = vsel %vm635_vm6, %v637_v50, %v633_v18  ;;  %p1130_p11 = scmp.ne.s32.totalorder %s1128_s30, %s1129_s29  ;;  %p1135_p1 = scmp.lt.s32.totalorder %s1133_s4, %s1129_s29 }
 0x2ce   : > { %v642_v4 = vmul.f32 %v1496_v11, %v638_v19 }
 0x2cf   : > { %p1131_p12 = pnand %p1130_p11, %p1367_p5  ;;  %p1136_p2 = por %p1135_p1, %p1134_p0 }
 0x2d0   : > { %v698_v21 = vmul.f32 %v654_v15, %v642_v4 }
 0x2d1   : > { %p1132_p13 = pneg %p1131_p12 }
 0x2d2   : > { %v702_v11 = vsel %vm554_vm5, %v698_v21, 0.0 }
 0x2d3   : > { %709 = vadd.xlane.f32.xlu2 %v702_v11  ;;  %689 = vadd.xlane.f32.xlu1 %v684_v22  ;;  %p1137_p3 = pnand %p1136_p2, %p1132_p13 }
 0x2d5   : > { %1140 = shalt.err (!%p1137_p3)
}
 0x2d6   : > { %s1270_s1 = smov 128   ;;  %s1271_s18 = smov 8   ;;  %v685_v48 = vmul.f32 %v681_v46, %v681_v46 }
 0x2d7   : > { %1030 = dma.vmem_to_hbm [thread:$0]  (%p1367_p5), %s1529_s25, 512, %s781_s26, %s1545_s3, %s1270_s1, %s1270_s1, %s1271_s18  }
 0x2d8   : > { %s761_s17 = sshll.u32 %s1445_s12, 4  ;;  %s763_s5 = sshll.u32 %s760_s2, 4  ;;  %s762_s17 = int_to_ptr.vmem [resolvable:$true] %s761_s17  ;;  %s764_s5 = int_to_ptr.hbm [resolvable:$true] %s763_s5 }
 0x2d9   : > { %s734_s4 = scalar_lea.sflag [#allocation3], %s1436_s28  ;;  %s1155_s30 = sshra.s32 %s764_s5, 4  ;;  %s1156_s30 = int_to_ptr.hbm [resolvable:$true] %s1155_s30 }
 0x2da   : > { %s1157_s29 = scalar_lea.hbm %s1156_s30, 32  ;;  %s1161_s6 = scalar_lea.hbm %s1660_s7, 64 }
 0x2db   : > { %p1158_p4 = scmp.ne.s32.totalorder %s1156_s30, %s1157_s29  ;;  %p1162_p9 = scmp.lt.s32.totalorder %s1156_s30, %s1660_s7 }
 0x2dc   : > { %p1163_p10 = scmp.lt.s32.totalorder %s1161_s6, %s1157_s29 }
 0x2dd   : > { %p1159_p7 = pnand %p1158_p4, %p1367_p5 }
 0x2de   : > { %p1164_p11 = por %p1163_p10, %p1162_p9 }
 0x2df   : > { %p1160_p8 = pneg %p1159_p7 }
 0x2e1   : > { %p1165_p12 = pnand %p1164_p11, %p1160_p8 }
 0x2e3   : > { %1168 = shalt.err (!%p1165_p12)
}
 0x2e4   : > { %1029 = dma.vmem_to_hbm [thread:$0]  (%p1367_p5), %s762_s17, 512, %s764_s5, %s734_s4, %s1270_s1, %s1270_s1, %s1271_s18   ;;  %691 = vadd.xlane.f32.xlu2 %v685_v48 }
 0x2e5   : > { %s1684_s2 = sshll.u32 %s1464_s20, 4  ;;  %s794_s8 = scalar_lea.hbm %s1662_s9, %s1527_s27  ;;  %s796_s2 = int_to_ptr.vmem [resolvable:$true] %s1684_s2 }
 0x2e6   : > { %s797_s6 = sshll.u32 %s794_s8, 4  ;;  %s1189_s17 = scalar_lea.hbm %s1662_s9, 64  ;;  %s798_s6 = int_to_ptr.hbm [resolvable:$true] %s797_s6 }
 0x2e7   : > { %s1183_s22 = sshra.s32 %s798_s6, 4  ;;  %s1184_s22 = int_to_ptr.hbm [resolvable:$true] %s1183_s22 }
 0x2e8   : > { %s1185_s26 = scalar_lea.hbm %s1184_s22, 32  ;;  %p1190_p2 = scmp.lt.s32.totalorder %s1184_s22, %s1662_s9 }
 0x2e9   : > { %p1186_p13 = scmp.ne.s32.totalorder %s1184_s22, %s1185_s26  ;;  %p1191_p3 = scmp.lt.s32.totalorder %s1189_s17, %s1185_s26 }
 0x2eb   : > { %p1187_p0 = pnand %p1186_p13, %p1367_p5  ;;  %p1192_p4 = por %p1191_p3, %p1190_p2 }
 0x2ed   : > { %p1188_p1 = pneg %p1187_p0 }
 0x2ef   : > { %p1193_p7 = pnand %p1192_p4, %p1188_p1 }
 0x2f1   : > { %1196 = shalt.err (!%p1193_p7)
}
 0x2f2   : > { %1031 = dma.vmem_to_hbm [thread:$0]  (%p1367_p5), %s796_s2, 512, %s798_s6, %s1545_s3, %s1270_s1, %s1270_s1, %s1271_s18   ;;  %vm715_vm5 = vcmp.eq.s32.totalorder %v1486_v6, 0  ;;  %v688_v23 = vpop.xlane.xlu0 %687  ;;  %vm720_vm7 = vcmp.eq.s32.totalorder %v1486_v6, 1 }
 0x2f3   : > { %v716_v26 = vsel %vm715_vm5, %v688_v23, 0.0  ;;  %s381_s4 = scalar_lea.vmem [#allocation7], %s1442_s11  ;;  %s811_s21 = scalar_lea.hbm %s1663_s10, %s1527_s27 }
 0x2f4   : > { %s812_s0 = sshll.u32 %s381_s4, 4  ;;  %s814_s2 = sshll.u32 %s811_s21, 4  ;;  %s813_s0 = int_to_ptr.vmem [resolvable:$true] %s812_s0  ;;  %s815_s2 = int_to_ptr.hbm [resolvable:$true] %s814_s2 }
 0x2f5   : > { %s749_s12 = scalar_lea.sflag [#allocation8], %s1436_s28  ;;  %s1211_s25 = sshra.s32 %s815_s2, 4  ;;  %s1212_s25 = int_to_ptr.hbm [resolvable:$true] %s1211_s25 }
 0x2f6   : > { %s1213_s27 = scalar_lea.hbm %s1212_s25, 32  ;;  %s1217_s22 = scalar_lea.hbm %s1663_s10, 64 }
 0x2f7   : > { %p1214_p8 = scmp.ne.s32.totalorder %s1212_s25, %s1213_s27  ;;  %p1218_p11 = scmp.lt.s32.totalorder %s1212_s25, %s1663_s10 }
 0x2f8   : > { %p1219_p12 = scmp.lt.s32.totalorder %s1217_s22, %s1213_s27 }
 0x2f9   : > { %p1215_p9 = pnand %p1214_p8, %p1367_p5 }
 0x2fa   : > { %p1220_p13 = por %p1219_p12, %p1218_p11 }
 0x2fb   : > { %p1216_p10 = pneg %p1215_p9 }
 0x2fd   : > { %p1221_p0 = pnand %p1220_p13, %p1216_p10 }
 0x329   : > { %v704_v24 = vpop.xlane.xlu2 %703 }
 0x32a   : > { %v711_v25 = vsub.f32 0.0, %v704_v24 }
 0x32c   : > { %v721_v27 = vsel %vm720_vm7, %v711_v25, 0.0 }
 0x32d   : > { %v725_v28 = vadd.f32 %v721_v27, %v716_v26 }
 0x32f   : > { %729 = vst [vmem:[%s381_s4] sm:$0xff] %v725_v28 }
 0x336   : > { %v706_v29 = vpop.xlane.xlu0 %705 }
 0x337   : > { %v712_v31 = vsub.f32 0.0, %v706_v29 }
 0x339   : > { %v722_v37 = vsel %vm720_vm7, %v712_v31, 0.0 }
 0x33e   : > { %v708_v30 = vpop.xlane.xlu1 %707  ;;  %v694_v32 = vpop.xlane.xlu0 %693 }
 0x33f   : > { %v719_v39 = vsel %vm715_vm5, %v694_v32, 0.0  ;;  %v713_v42 = vsub.f32 0.0, %v708_v30 }
 0x341   : > { %v723_v45 = vsel %vm720_vm7, %v713_v42, 0.0 }
 0x346   : > { %v710_v33 = vpop.xlane.xlu2 %709  ;;  %v690_v34 = vpop.xlane.xlu1 %689 }
 0x347   : > { %v714_v35 = vsub.f32 0.0, %v710_v33  ;;  %v717_v36 = vsel %vm715_vm5, %v690_v34, 0.0 }
 0x348   : > { %v726_v38 = vadd.f32 %v722_v37, %v717_v36 }
 0x349   : > { %v724_v40 = vsel %vm720_vm7, %v714_v35, 0.0 }
 0x34a   : > { %v728_v41 = vadd.f32 %v724_v40, %v719_v39  ;;  %730 = vst [vmem:[%s381_s4 + $0x8] sm:$0xff] %v726_v38 }
 0x34c   : > { %732 = vst [vmem:[%s381_s4 + $0x18] sm:$0xff] %v728_v41 }
 0x357   : > { %v692_v43 = vpop.xlane.xlu2 %691 }
 0x358   : > { %v718_v44 = vsel %vm715_vm5, %v692_v43, 0.0 }
 0x359   : > { %v727_v47 = vadd.f32 %v723_v45, %v718_v44 }
 0x35b   : > { %731 = vst [vmem:[%s381_s4 + $0x10] sm:$0xff] %v727_v47 }
 0x35c   : > { %1224 = shalt.err (!%p1221_p0)
}
 0x35d   : > { %1032 = dma.vmem_to_hbm [thread:$0]  (%p1367_p5), %s813_s0, 512, %s815_s2, %s749_s12, %s1270_s1, %s1270_s1, %s1271_s18  }
 0x35e PF: > { %p1050_p1 = scmp.ge.s32.totalorder %s1267_s16, 2  ;;  %s829_s28 = sand.u32 1, %s1255_s13  }
 0x35f   : > { %s830_s29 = scalar_lea.sflag [#allocation3], %s829_s28 }
 0x360   : > { %p1038_p2 = pnand %p1050_p1, %p1371_p6 }
 0x362   : > { %p1039_p3 = pneg %p1038_p2 }
 0x364   : > { %1242 = dma.done.wait (%p1039_p3), %s830_s29, 512  }
 0x365   : > { %1244 = vsyncadd (%p1039_p3), %s830_s29, 4294966784  ;;  %s1685_s17 = sadd.s32 4294967294, %s1267_s16  }
 0x366   : > { %s839_s20 = sand.u32 1, %s1685_s17  }
 0x367   : > { %s840_s23 = scalar_lea.sflag [#allocation5], %s839_s20 }
 0x368   : > { %1246 = dma.done.wait (%p1039_p3), %s840_s23, 1024  }
 0x369   : > { %1248 = vsyncadd (%p1039_p3), %s840_s23, 4294966272  ;;  %s860_s5 = scalar_lea.sflag [#allocation8], %s829_s28 }
 0x36a   : > { %1250 = dma.done.wait (%p1039_p3), %s860_s5, 512  }
 0x36b   : > { %1252 = vsyncadd (%p1039_p3), %s860_s5, 4294966784  ;;  %s1686_s1 = sld [smem:[#allocation12_spill]]  ;;  %p27_p5 = scmp.ge.s32.totalorder %s1352_s19, 4  }
 0x36c   : > { %s1687_s13 = smov %s1259_s14  ;;  %s1688_s14 = smov %s1263_s15 }
 0x36d   : > { %s1690_s16 = smov %s1352_s19  ;;  %29 = sbr.rel (!%p27_p5) target bundleno = 16 (0x10), region = 132 }
 0x371   : > { %s1689_s15 = smov %s1686_s1 }
 0x372   :  { %866 = vsyncpa [#allocation3], 1 }
 0x373   :  { %868 = vsyncpa [#allocation3 + $0x1], 1 }
 0x374   :  { %869 = vsyncpa [#allocation5], 1 }
 0x375   :  { %871 = vsyncpa [#allocation5 + $0x1], 1 }
 0x376   :  { %872 = vsyncpa [#allocation8], 1 }
 0x377   :  { %874 = vsyncpa [#allocation8 + $0x1], 1 }

</bundles_post_ra>
